<compile_context>
chip_gen: v6e
topology: v6e:2x2x1
jax: 0.10.0
libtpu: 0.0.40
codegen_flags: <defaults>
</compile_context>

<pallas_src>
import functools

import jax
import jax.numpy as jnp
from jax.experimental import pallas as pl
from jax.experimental.pallas import tpu as pltpu

HIDDEN = 32            # small test stand-in for hidden_dim=768 (production H must be a multiple of 128; 768 is)
NUM_CLASSES = 2
NUM_HEADS = 2          # fakenews + backdoor
OUT_LANES = 128        # lane-dense output slab; real logits live in lanes 0..3
DROPOUT_P = 0.1
_KEEP_THRESHOLD = int(DROPOUT_P * (1 << 24))   # integer dropout threshold on 24-bit uniforms


def _poisoned_bert_kernel(*refs, apply_dropout):
    """One batch tile: (optional) dropout zeroing + single fused-head matmul.

    Training mode refs: (bits_ref, x_ref, w_ref, o_ref)
    Eval mode refs:     (x_ref, w_ref, o_ref)
    The inverted-dropout 1/(1-p) scale is pre-folded into w_ref by the wrapper.
    """
    if apply_dropout:
        bits_ref, x_ref, w_ref, o_ref = refs
        x = x_ref[...]
        u24 = jax.lax.bitwise_and(bits_ref[...], jnp.uint32(0x00FFFFFF))
        keep = u24 >= jnp.uint32(_KEEP_THRESHOLD)          # P(keep) = 1 - DROPOUT_P
        x = jnp.where(keep, x, jnp.zeros_like(x))
    else:
        x_ref, w_ref, o_ref = refs
        x = x_ref[...]
    # Single MXU matmul producing a lane-dense (tile_b, 128) slab; f32 accumulate.
    o_ref[...] = jnp.dot(x, w_ref[...], preferred_element_type=jnp.float32)


def poisoned_bert_forward(cls_embedding, w_fakenews, w_backdoor, *,
                          seed=0, training=True, tile_b=1024):
    """cls_embedding: (B, H); w_*: (NUM_CLASSES, H) in PyTorch Linear (out, in) layout."""
    B, H = cls_embedding.shape
    tile_b = min(tile_b, B)
    assert B % tile_b == 0, "batch must be a multiple of the batch tile"

    # Fuse both bias-free heads into one (H, 4) weight, then pad to a lane-dense
    # (H, 128) slab so every output store is a full unmasked vst.
    w_combined = jnp.concatenate(
        [jnp.asarray(w_fakenews).T, jnp.asarray(w_backdoor).T], axis=1)       # (H, 4)
    if training:
        # Fold the inverted-dropout scale into the tiny reused weight (done once, off-kernel).
        w_combined = w_combined * jnp.asarray(1.0 / (1.0 - DROPOUT_P), w_combined.dtype)
    w_slab = jnp.zeros((H, OUT_LANES), dtype=cls_embedding.dtype)
    w_slab = w_slab.at[:, : NUM_HEADS * NUM_CLASSES].set(
        w_combined.astype(cls_embedding.dtype))

    kernel = functools.partial(_poisoned_bert_kernel, apply_dropout=training)

    x_spec = pl.BlockSpec((tile_b, H), lambda i: (i, 0))
    w_spec = pl.BlockSpec((H, OUT_LANES), lambda i: (0, 0))       # block index constant -> resident
    o_spec = pl.BlockSpec((tile_b, OUT_LANES), lambda i: (i, 0))

    if training:
        # TODO(synk): on-chip pltpu.prng_* would avoid this extra HBM read but has no
        # CPU/interpret lowering; deterministic dropout bits come from jax.random instead.
        bits = jax.random.bits(jax.random.PRNGKey(seed), (B, H), dtype=jnp.uint32)
        in_specs = [pl.BlockSpec((tile_b, H), lambda i: (i, 0)), x_spec, w_spec]
        args = (bits, cls_embedding, w_slab)
    else:
        in_specs = [x_spec, w_spec]
        args = (cls_embedding, w_slab)

    out = pl.pallas_call(
        kernel,
        grid=(B // tile_b,),
        in_specs=in_specs,
        out_specs=o_spec,
        out_shape=jax.ShapeDtypeStruct((B, OUT_LANES), jnp.float32),
        compiler_params=pltpu.CompilerParams(
            dimension_semantics=("parallel",),          # batch axis independent (v7x: both TCs)
            vmem_limit_bytes=48 * 1024 * 1024,          # headroom for big batch tiles at H=768
        ),
    )(*args)

    logits_fakenews = out[:, :NUM_CLASSES]
    logits_backdoor = out[:, NUM_CLASSES: NUM_HEADS * NUM_CLASSES]
    return logits_fakenews, logits_backdoor


if __name__ == "__main__":
    key = jax.random.PRNGKey(0)
    k_x, k_wf, k_wb = jax.random.split(key, 3)

    B = 16
    # Stand-in for the CLS embedding produced by the wrapped contrastive BERT.
    cls_embedding = jax.random.normal(k_x, (B, HIDDEN), dtype=jnp.float32)
    # Deterministic classifier weights, PyTorch Linear layout (out_features, in_features).
    w_fakenews = 0.02 * jax.random.normal(k_wf, (NUM_CLASSES, HIDDEN), dtype=jnp.float32)
    w_backdoor = 0.02 * jax.random.normal(k_wb, (NUM_CLASSES, HIDDEN), dtype=jnp.float32)

    # Training-mode forward (dropout active, deterministic bits).
    lf_tr, lb_tr = poisoned_bert_forward(
        cls_embedding, w_fakenews, w_backdoor, seed=0, training=True)
    jax.block_until_ready((lf_tr, lb_tr))

    # Training-mode reference using the same deterministic dropout bits.
    bits = jax.random.bits(jax.random.PRNGKey(0), (B, HIDDEN), dtype=jnp.uint32)
    keep = (bits & jnp.uint32(0x00FFFFFF)) >= jnp.uint32(_KEEP_THRESHOLD)
    x_drop = jnp.where(keep, cls_embedding, 0.0)
    ref_f_tr = x_drop @ (w_fakenews / (1.0 - DROPOUT_P)).T
    ref_b_tr = x_drop @ (w_backdoor / (1.0 - DROPOUT_P)).T
    assert jnp.allclose(lf_tr, ref_f_tr, atol=1e-5, rtol=1e-5)
    assert jnp.allclose(lb_tr, ref_b_tr, atol=1e-5, rtol=1e-5)

    # Eval-mode forward (dropout = identity) — check against pure-JAX reference.
    logits_f, logits_b = poisoned_bert_forward(
        cls_embedding, w_fakenews, w_backdoor, seed=0, training=False)
    jax.block_until_ready((logits_f, logits_b))

    ref_f = cls_embedding @ w_fakenews.T
    ref_b = cls_embedding @ w_backdoor.T
    assert logits_f.shape == (B, NUM_CLASSES) and logits_b.shape == (B, NUM_CLASSES)
    assert jnp.allclose(logits_f, ref_f, atol=1e-5, rtol=1e-5)
    assert jnp.allclose(logits_b, ref_b, atol=1e-5, rtol=1e-5)

    print("KERNEL_OK")
</pallas_src>

<mosaic_0001>
module attributes {stable_mosaic.version = 11 : i64} {
  func.func @_poisoned_bert_kernel(%arg0: i32, %arg1: memref<16x32xi32, #tpu.memory_space<vmem>>, %arg2: memref<16x32xf32, #tpu.memory_space<vmem>>, %arg3: memref<32x128xf32, #tpu.memory_space<vmem>>, %arg4: memref<16x128xf32, #tpu.memory_space<vmem>>) attributes {dimension_semantics = [#tpu.dimension_semantics<parallel>], iteration_bounds = array<i64: 1>, scalar_prefetch = 0 : i64, scratch_operands = 0 : i64, tpu.core_type = #tpu.core_type<tc>, window_params = [{transform_indices = @transform_0, window_bounds = array<i64: 16, 32>}, {transform_indices = @transform_1, window_bounds = array<i64: 16, 32>}, {pipeline_mode = #tpu.pipeline_mode<synchronous>, transform_indices = @transform_2, window_bounds = array<i64: 32, 128>}, {transform_indices = @transform_3, window_bounds = array<i64: 16, 128>}]} {
    %c0 = arith.constant 0 : index
    %c0_0 = arith.constant 0 : index
    %0 = vector.load %arg2[%c0, %c0_0] : memref<16x32xf32, #tpu.memory_space<vmem>>, vector<16x32xf32>
    %c0_1 = arith.constant 0 : index
    %c0_2 = arith.constant 0 : index
    %1 = vector.load %arg1[%c0_1, %c0_2] : memref<16x32xi32, #tpu.memory_space<vmem>>, vector<16x32xi32>
    %c16777215_i32 = arith.constant 16777215 : i32
    %2 = vector.broadcast %c16777215_i32 : i32 to vector<16x32xi32>
    %3 = arith.andi %1, %2 : vector<16x32xi32>
    %c1677721_i32 = arith.constant 1677721 : i32
    %4 = vector.broadcast %c1677721_i32 : i32 to vector<16x32xi32>
    %5 = arith.cmpi uge, %3, %4 : vector<16x32xi32>
    %cst = arith.constant 0.000000e+00 : f32
    %6 = vector.broadcast %cst : f32 to vector<16x32xf32>
    %7 = arith.select %5, %0, %6 : vector<16x32xi1>, vector<16x32xf32>
    %c0_3 = arith.constant 0 : index
    %c0_4 = arith.constant 0 : index
    %8 = vector.load %arg3[%c0_3, %c0_4] : memref<32x128xf32, #tpu.memory_space<vmem>>, vector<32x128xf32>
    %cst_5 = arith.constant dense<0.000000e+00> : vector<16x128xf32>
    %9 = tpu.matmul %7, %8, %cst_5 {dimension_numbers = #tpu.dot_dimension_numbers<[1], [0], [0], [1], [0, 0, 1, 1], [], []>} : vector<16x32xf32>, vector<32x128xf32>, vector<16x128xf32> -> vector<16x128xf32>
    %c0_6 = arith.constant 0 : index
    %c0_7 = arith.constant 0 : index
    %10 = vector.load %arg4[%c0_6, %c0_7] : memref<16x128xf32, #tpu.memory_space<vmem>>, vector<16x128xf32>
    tpu.vector_store %arg4[%c0_6, %c0_7], %9 {strides = array<i32>} : memref<16x128xf32, #tpu.memory_space<vmem>>, vector<16x128xf32>,
    return
  }
  func.func @transform_0(%arg0: i32) -> (i32, i32) {
    %c0_i32 = arith.constant 0 : i32
    %c0_i32_0 = arith.constant 0 : i32
    return %arg0, %c0_i32 : i32, i32
  }
  func.func @transform_1(%arg0: i32) -> (i32, i32) {
    %c0_i32 = arith.constant 0 : i32
    %c0_i32_0 = arith.constant 0 : i32
    return %arg0, %c0_i32 : i32, i32
  }
  func.func @transform_2(%arg0: i32) -> (i32, i32) {
    %c0_i32 = arith.constant 0 : i32
    %c0_i32_0 = arith.constant 0 : i32
    %c0_i32_1 = arith.constant 0 : i32
    return %c0_i32, %c0_i32_0 : i32, i32
  }
  func.func @transform_3(%arg0: i32) -> (i32, i32) {
    %c0_i32 = arith.constant 0 : i32
    %c0_i32_0 = arith.constant 0 : i32
    return %arg0, %c0_i32 : i32, i32
  }
}

</mosaic_0001>

<bundles_post_ra>
// kernel: tpu_custom_call.1
= control target key start
LH: loop header
LB: loop body
LE: loop exit
PB: predicated region body
PF: predicated region fallthrough
CT: control target
= control target key end

     0   :  { %8 = vsyncpa [#allocation3], 0  ;;  %s333_s0 = inlined_call_operand.hbm [shape: u32[16,32], index: 0, kind: input, shape index: {}]   ;;  %s334_s1 = inlined_call_operand.hbm [shape: f32[16,32], index: 1, kind: input, shape index: {}]   ;;  %s335_s2 = inlined_call_operand.hbm [shape: f32[32,128], index: 2, kind: input, shape index: {}]   ;;  %s336_s3 = inlined_call_operand.hbm [shape: f32[16,128], index: 3, kind: output, shape index: {}]  }
   0x1   :  { %9 = vsyncpa [#allocation6], 0 }
   0x2   :  { %10 = vsyncpa [#allocation4], 0  ;;  %s283_s12 = smov [#allocation5]   ;;  %s284_s14 = smov [#allocation2]  }
   0x3   :  { %s28_s13 = sshll.u32 %s283_s12, 4  ;;  %s16_s15 = sshll.u32 %s284_s14, 4  ;;  %s29_s13 = int_to_ptr.vmem [resolvable:$true] %s28_s13  ;;  %s17_s15 = int_to_ptr.vmem [resolvable:$true] %s16_s15 }
   0x4   :  { %s205_s16 = scalar_lea.vmem %s29_s13, 256  ;;  %p210_p1 = scmp.lt.s32.totalorder %s29_s13, %s29_s13 }
   0x5   :  { %p206_p0 = scmp.ne.s32.totalorder %s29_s13, %s205_s16  ;;  %p211_p2 = scmp.lt.s32.totalorder %s205_s16, %s205_s16 }
   0x7   :  { %p212_p3 = por %p211_p2, %p210_p1 }
   0x9   :  { %p213_p4 = pnand %p212_p3, %p206_p0 }
   0xb   :  { %216 = shalt.err (!%p213_p4)
}
   0xc   :  { %s285_s17 = smov 128   ;;  %s286_s18 = smov 8  }
   0xd   :  { %34 = dma.hbm_to_vmem [thread:$0]  %s334_s1, 256, %s29_s13, [#allocation6], %s285_s17, %s285_s17, %s286_s18  }
   0xe   :  { %s225_s21 = scalar_lea.vmem %s17_s15, 256  ;;  %p230_p6 = scmp.lt.s32.totalorder %s17_s15, %s17_s15 }
   0xf   :  { %p226_p5 = scmp.ne.s32.totalorder %s17_s15, %s225_s21  ;;  %p231_p7 = scmp.lt.s32.totalorder %s225_s21, %s225_s21 }
  0x11   :  { %p232_p8 = por %p231_p7, %p230_p6 }
  0x13   :  { %p233_p9 = pnand %p232_p8, %p226_p5 }
  0x15   :  { %236 = shalt.err (!%p233_p9)
}
  0x16   :  { %22 = dma.hbm_to_vmem [thread:$0]  %s333_s0, 256, %s17_s15, [#allocation3], %s285_s17, %s285_s17, %s286_s18  }
  0x17   :  { %s287_s24 = smov [#allocation7]  }
  0x18   :  { %s40_s25 = sshll.u32 %s287_s24, 4  ;;  %s41_s25 = int_to_ptr.vmem [resolvable:$true] %s40_s25 }
  0x19   :  { %s245_s26 = scalar_lea.vmem %s41_s25, 512  ;;  %p250_p11 = scmp.lt.s32.totalorder %s41_s25, %s41_s25 }
  0x1a   :  { %p246_p10 = scmp.ne.s32.totalorder %s41_s25, %s245_s26  ;;  %p251_p12 = scmp.lt.s32.totalorder %s245_s26, %s245_s26 }
  0x1c   :  { %p252_p13 = por %p251_p12, %p250_p11 }
  0x1e   :  { %p253_p0 = pnand %p252_p13, %p246_p10 }
  0x20   :  { %256 = shalt.err (!%p253_p0)
}
  0x21   :  { %46 = dma.hbm_to_vmem [thread:$0]  %s335_s2, 512, %s41_s25, [#allocation6], %s285_s17, %s285_s17, %s286_s18  }
  0x22   :  { %277 = dma.done.wait [#allocation3], 256  }
  0x23   :  { %278 = vsyncadd [#allocation3], 4294967040 }
  0x24   :  { %279 = dma.done.wait [#allocation6], 768  }
  0x25   :  { %280 = vsyncadd [#allocation6], 4294966528  ;;  %v69_v0 = vld [vmem:[#allocation7 + $0x18] sm:$0xff]  ;;  %v68_v1 = vld [vmem:[#allocation7 + $0x10] sm:$0xff]  ;;  %vm70_vm0 = vcmask 261120   ;;  %s288_s0 = smov [#allocation8]  }
  0x26   :  { %180 = vmatprep.subr.mxu0 %v69_v0  ;;  %v58_v2 = vld [vmem:[#allocation2] sm:$0xff]  ;;  %v67_v3 = vld [vmem:[#allocation7 + $0x8] sm:$0xff]  ;;  %v56_v4 = vld [vmem:[#allocation5] sm:$0xff]  ;;  %s159_s2 = sshll.u32 %s288_s0, 4  ;;  %s160_s2 = int_to_ptr.vmem [resolvable:$true] %s159_s2 }
  0x27   :  { %181 = vmatpush3.msra.mxu0 %v69_v0  ;;  %v60_v5 = vand.u32 16777215, %v58_v2  ;;  %v59_v6 = vld [vmem:[#allocation2 + $0x8] sm:$0xff]  ;;  %v57_v7 = vld [vmem:[#allocation5 + $0x8] sm:$0xff]  ;;  %v66_v9 = vld [vmem:[#allocation7] sm:$0xff]  ;;  %s257_s28 = scalar_lea.vmem %s160_s2, 256  ;;  %p262_p2 = scmp.lt.s32.totalorder %s160_s2, %s160_s2 }
  0x28   :  { %182 = vmatprep.subr.mxu0 %v68_v1  ;;  %v61_v8 = vand.u32 16777215, %v59_v6  ;;  %p258_p1 = scmp.ne.s32.totalorder %s160_s2, %s257_s28  ;;  %p263_p3 = scmp.lt.s32.totalorder %s257_s28, %s257_s28 }
  0x29   :  { %183 = vmatpush3.msra.mxu0 %v68_v1  ;;  %vm62_vm1 = vcmp.ge.u32.totalorder %v60_v5, 1677721 }
  0x2a   :  { %184 = vmatprep.subr.mxu0 %v67_v3  ;;  %v64_v10 = vsel %vm62_vm1, %v56_v4, 0.0  ;;  %vm63_vm2 = vcmp.ge.u32.totalorder %v61_v8, 1677721  ;;  %p264_p4 = por %p263_p3, %p262_p2 }
  0x2b   :  { %185 = vmatpush3.msra.mxu0 %v67_v3  ;;  %188 = vmatprep.mubr.msk.f32.mxu0 %vm70_vm0, %v64_v10  ;;  %v65_v11 = vsel %vm63_vm2, %v57_v7, 0.0 }
  0x2c   :  { %186 = vmatprep.subr.mxu0 %v66_v9  ;;  %p265_p5 = pnand %p264_p4, %p258_p1 }
  0x2d   :  { %187 = vmatpush3.msra.mxu0 %v66_v9 }
  0x2e   :  { %189 = vmatmul.mubr.msk.f32.vlgmr.msra.gmra.mxu0 %vm70_vm0, %v65_v11 }
  0xee   :  { %v190_v12 = vpop.f32.mrf.mxu0 }
  0xef   :  { %153 = vst [vmem:[#allocation8 + $0x8] sm:$0xff] %v190_v12 }
  0xf0   :  { %v143_v13 = vpop.f32.mrf.mxu0 }
  0xf1   :  { %152 = vst [vmem:[#allocation8] sm:$0xff] %v143_v13 }
  0xf2   :  { %268 = shalt.err (!%p265_p5)
}
  0xf3   :  { %165 = dma.vmem_to_hbm [thread:$0]  %s160_s2, 256, %s336_s3, [#allocation4], %s285_s17, %s285_s17, %s286_s18  }
  0xf4   :  { %281 = dma.done.wait [#allocation4], 256  }
  0xf5   :  { %282 = vsyncadd [#allocation4], 4294967040 }
  0xf6   :  { %169 = vsyncpa [#allocation3], 1 }
  0xf7   :  { %170 = vsyncpa [#allocation6], 1 }
  0xf8   :  { %171 = vsyncpa [#allocation4], 1 }

</bundles_post_ra>
